<compile_context>
chip_gen: v7x
topology: tpu7x:2x2x1
jax: 0.10.0
libtpu: 0.0.40
codegen_flags: <defaults>
</compile_context>

<pallas_src>
import functools

import jax
import jax.numpy as jnp
from jax import lax
from jax.experimental import pallas as pl
from jax.experimental.pallas import tpu as pltpu


def _vector_mean_ln_kernel(emb_ref, mask_ref, gamma_ref, beta_ref, out_ref,
                           acc_ref, cacc_ref, msum_ref, *, ln_eps, mean_eps):
    # emb_ref:   (tB, tS, H)  native dtype (bf16/f32)
    # mask_ref:  (tB, 1, tS)  f32
    # gamma_ref: (1, 1, H)    f32
    # beta_ref:  (1, 1, H)    f32
    # out_ref:   (tB, 1, H)   f32 (block constant over the s grid axis)
    # acc_ref:   (tB, 1, H)   f32 scratch: running sum_s (m_s * r_s) * x_s
    # cacc_ref:  (tB, 1, 1)   f32 scratch: running sum_s  m_s * r_s * mu_s
    # msum_ref:  (tB, 1, 1)   f32 scratch: running sum_s  m_s
    s_idx = pl.program_id(1)

    @pl.when(s_idx == 0)
    def _init():
        acc_ref[...] = jnp.zeros_like(acc_ref)
        cacc_ref[...] = jnp.zeros_like(cacc_ref)
        msum_ref[...] = jnp.zeros_like(msum_ref)

    # ---- two elementwise passes only: cast + square (both feed the MXU) ----
    x = emb_ref[...].astype(jnp.float32)                    # (tB, tS, H)
    xsq = x * x                                             # (tB, tS, H)

    tB = x.shape[0]
    hidden = x.shape[-1]
    inv_h = 1.0 / float(hidden)
    ones_h = jnp.ones((tB, 1, hidden), jnp.float32)

    # Row statistics as MXU dots (contraction over H), lane-dense over tS.
    s1 = jnp.einsum('boh,bsh->bos', ones_h, x,
                    preferred_element_type=jnp.float32)     # (tB, 1, tS)
    s2 = jnp.einsum('boh,bsh->bos', ones_h, xsq,
                    preferred_element_type=jnp.float32)     # (tB, 1, tS)
    mu = s1 * inv_h                                         # (tB, 1, tS)
    var = jnp.maximum(s2 * inv_h - mu * mu, 0.0)            # clamp fp roundoff
    r = lax.rsqrt(var + ln_eps)                             # (tB, 1, tS)  EUP

    # ---- masked LN reduction on the MXU (inv_std folded into the weights) ----
    m = mask_ref[...].astype(jnp.float32)                   # (tB, 1, tS)
    w = m * r                                               # (tB, 1, tS)
    acc_ref[...] += jnp.einsum('bos,bsh->boh', w, x,
                               preferred_element_type=jnp.float32)
    cacc_ref[...] += jnp.sum(w * mu, axis=-1, keepdims=True)   # (tB,1,1)
    msum_ref[...] += jnp.sum(m, axis=-1, keepdims=True)        # (tB,1,1)

    # ---- finalize: fold gamma/beta once, normalize by (sum(mask)+eps) ----
    @pl.when(s_idx == pl.num_programs(1) - 1)
    def _finalize():
        g = gamma_ref[...]                                  # (1, 1, H)
        b = beta_ref[...]                                   # (1, 1, H)
        msum = msum_ref[...]                                # (tB, 1, 1)
        vec = (g * (acc_ref[...] - cacc_ref[...]) + b * msum) / (msum + mean_eps)
        out_ref[...] = vec.astype(out_ref.dtype)


def _plan_tiles(B, S, H, itemsize, budget_bytes):
    """Pick (tB, Bp, tS, Sp).

    Per-step VMEM estimate per sequence row:
      2 * native input (double-buffered)  +  2 * f32 temporaries (x, x*x)
    tS is either the full S (single tile) or a multiple of 128 (mask lane-axis
    and bf16 sublane-packing constraints); S/B are zero-padded when needed.
    """
    tB = B if B <= 8 else 8

    def bytes_per_seq_row(tb):
        return tb * H * (2 * itemsize + 8)

    # Very large H: shrink the batch tile so even a 128-row tile fits.
    while tB > 1 and bytes_per_seq_row(tB) * 128 > budget_bytes:
        tB = max(1, tB // 2)

    Bp = -(-B // tB) * tB
    max_ts = max(1, budget_bytes // bytes_per_seq_row(tB))
    if S <= max_ts:
        tS, Sp = S, S                 # single tile: block dims == full dims
    else:
        tS = max(128, (max_ts // 128) * 128)
        Sp = -(-S // tS) * tS         # zero-mask padding rows are inert
    return tB, Bp, tS, Sp


def vector_mean_ln_head(embedding, attention_mask, gamma, beta,
                        layer_norm_eps=1e-5,
                        step_budget_bytes=24 * 1024 * 1024):
    """embedding: [B, S, H] (any float dtype), attention_mask: [B, S] -> [B, H] f32."""
    B, S, H = embedding.shape
    itemsize = jnp.dtype(embedding.dtype).itemsize
    tB, Bp, tS, Sp = _plan_tiles(B, S, H, itemsize, step_budget_bytes)
    num_b = Bp // tB
    num_s = Sp // tS

    mask_f = attention_mask.astype(jnp.float32)
    emb = embedding
    if Bp != B or Sp != S:
        # Zero embedding rows + zero mask contribute exactly nothing.
        emb = jnp.pad(emb, ((0, Bp - B), (0, Sp - S), (0, 0)))
        mask_f = jnp.pad(mask_f, ((0, Bp - B), (0, Sp - S)))

    mask3 = mask_f.reshape(Bp, 1, Sp)                       # lane-dense mask
    gamma3 = gamma.astype(jnp.float32).reshape(1, 1, H)
    beta3 = beta.astype(jnp.float32).reshape(1, 1, H)

    kernel = functools.partial(_vector_mean_ln_kernel,
                               ln_eps=float(layer_norm_eps), mean_eps=1e-8)

    out = pl.pallas_call(
        kernel,
        out_shape=jax.ShapeDtypeStruct((Bp, 1, H), jnp.float32),
        grid_spec=pltpu.PrefetchScalarGridSpec(
            num_scalar_prefetch=0,
            grid=(num_b, num_s),
            in_specs=[
                pl.BlockSpec((tB, tS, H), lambda b, s: (b, s, 0)),   # embedding
                pl.BlockSpec((tB, 1, tS), lambda b, s: (b, 0, s)),   # mask
                pl.BlockSpec((1, 1, H), lambda b, s: (0, 0, 0)),     # gamma
                pl.BlockSpec((1, 1, H), lambda b, s: (0, 0, 0)),     # beta
            ],
            out_specs=pl.BlockSpec((tB, 1, H), lambda b, s: (b, 0, 0)),
            scratch_shapes=[
                pltpu.VMEM((tB, 1, H), jnp.float32),   # weighted-sum accumulator
                pltpu.VMEM((tB, 1, 1), jnp.float32),   # sum(m*r*mu) accumulator
                pltpu.VMEM((tB, 1, 1), jnp.float32),   # mask-total accumulator
            ],
        ),
        compiler_params=pltpu.CompilerParams(
            dimension_semantics=("parallel", "arbitrary"),
            vmem_limit_bytes=48 * 1024 * 1024,
        ),
    )(emb, mask3, gamma3, beta3)
    return out.reshape(Bp, H)[:B]


def _reference(embedding, attention_mask, gamma, beta, layer_norm_eps=1e-5):
    x = embedding.astype(jnp.float32)
    mu = jnp.mean(x, axis=-1, keepdims=True)
    var = jnp.mean(jnp.square(x - mu), axis=-1, keepdims=True)
    y = (x - mu) * lax.rsqrt(var + layer_norm_eps) * gamma + beta
    m = attention_mask.astype(jnp.float32)
    norm = jnp.sum(m, axis=1, keepdims=True) + 1e-8
    return jnp.sum(y * m[..., None], axis=1) / norm


if __name__ == "__main__":
    layer_norm_eps = 1e-5
    key = jax.random.PRNGKey(0)
    k_emb, k_mask, k_g, k_b, k_rest = jax.random.split(key, 5)

    # --- small f32 path (single tile, tB = B) ---
    B, S, H = 2, 8, 32
    embedding = jax.random.normal(k_emb, (B, S, H), dtype=jnp.float32)
    attention_mask = (jax.random.uniform(k_mask, (B, S)) > 0.3).astype(jnp.float32)
    attention_mask = attention_mask.at[:, 0].set(1.0)
    gamma = 1.0 + 0.1 * jax.random.normal(k_g, (H,), dtype=jnp.float32)
    beta = 0.1 * jax.random.normal(k_b, (H,), dtype=jnp.float32)

    out = jax.block_until_ready(
        vector_mean_ln_head(embedding, attention_mask, gamma, beta, layer_norm_eps))
    ref = _reference(embedding, attention_mask, gamma, beta, layer_norm_eps)
    assert out.shape == (B, H)
    assert jnp.allclose(out, ref, atol=1e-4, rtol=1e-4)

    # --- bf16 path (native dtype streamed, f32 math on-chip) ---
    emb_bf16 = embedding.astype(jnp.bfloat16)
    out_bf = jax.block_until_ready(
        vector_mean_ln_head(emb_bf16, attention_mask, gamma, beta, layer_norm_eps))
    ref_bf = _reference(emb_bf16, attention_mask, gamma, beta, layer_norm_eps)
    assert jnp.allclose(out_bf, ref_bf, atol=1e-3, rtol=1e-3)

    # --- multi-tile path: exercises 128-multiple tS, zero-mask padding and
    #     cross-tile accumulation (tiny budget forces tS=128, Sp=256) ---
    B2, S2, H2 = 3, 200, 128
    ke, km, kg2, kb2 = jax.random.split(k_rest, 4)
    emb2 = jax.random.normal(ke, (B2, S2, H2), dtype=jnp.float32)
    mask2 = (jax.random.uniform(km, (B2, S2)) > 0.5).astype(jnp.float32)
    mask2 = mask2.at[:, 0].set(1.0)
    g2 = 1.0 + 0.1 * jax.random.normal(kg2, (H2,), dtype=jnp.float32)
    b2 = 0.1 * jax.random.normal(kb2, (H2,), dtype=jnp.float32)
    out2 = jax.block_until_ready(
        vector_mean_ln_head(emb2, mask2, g2, b2, layer_norm_eps,
                            step_budget_bytes=1 << 20))
    ref2 = _reference(emb2, mask2, g2, b2, layer_norm_eps)
    assert out2.shape == (B2, H2)
    assert jnp.allclose(out2, ref2, atol=1e-4, rtol=1e-4)

    print("KERNEL_OK")
</pallas_src>

<mosaic_0001>
module attributes {stable_mosaic.version = 11 : i64} {
  func.func @_vector_mean_ln_kernel(%arg0: i32, %arg1: i32, %arg2: memref<2x8x32xf32, #tpu.memory_space<vmem>>, %arg3: memref<2x1x8xf32, #tpu.memory_space<vmem>>, %arg4: memref<1x1x32xf32, #tpu.memory_space<vmem>>, %arg5: memref<1x1x32xf32, #tpu.memory_space<vmem>>, %arg6: memref<2x1x32xf32, #tpu.memory_space<vmem>>, %arg7: memref<2x1x32xf32, #tpu.memory_space<vmem>>, %arg8: memref<2x1x1xf32, #tpu.memory_space<vmem>>, %arg9: memref<2x1x1xf32, #tpu.memory_space<vmem>>) attributes {dimension_semantics = [#tpu.dimension_semantics<parallel>, #tpu.dimension_semantics<arbitrary>], iteration_bounds = array<i64: 1, 1>, scalar_prefetch = 0 : i64, scratch_operands = 3 : i64, tpu.core_type = #tpu.core_type<tc>, window_params = [{transform_indices = @transform_0, window_bounds = array<i64: 2, 8, 32>}, {transform_indices = @transform_1, window_bounds = array<i64: 2, 1, 8>}, {pipeline_mode = #tpu.pipeline_mode<synchronous>, transform_indices = @transform_2, window_bounds = array<i64: 1, 1, 32>}, {pipeline_mode = #tpu.pipeline_mode<synchronous>, transform_indices = @transform_3, window_bounds = array<i64: 1, 1, 32>}, {transform_indices = @transform_4, window_bounds = array<i64: 2, 1, 32>}]} {
    %c0_i32 = arith.constant 0 : i32
    %0 = arith.cmpi eq, %arg1, %c0_i32 : i32
    %1 = arith.extui %0 : i1 to i32
    %c0_i32_0 = arith.constant 0 : i32
    %2 = arith.cmpi ne, %1, %c0_i32_0 : i32
    scf.if %2 {
      %cst_35 = arith.constant 0.000000e+00 : f32
      %39 = vector.broadcast %cst_35 : f32 to vector<2x1x32xf32>
      %c0_36 = arith.constant 0 : index
      %c0_37 = arith.constant 0 : index
      %c0_38 = arith.constant 0 : index
      %40 = vector.load %arg7[%c0_36, %c0_37, %c0_38] : memref<2x1x32xf32, #tpu.memory_space<vmem>>, vector<2x1x32xf32>
      tpu.vector_store %arg7[%c0_36, %c0_37, %c0_38], %39 {strides = array<i32>} : memref<2x1x32xf32, #tpu.memory_space<vmem>>, vector<2x1x32xf32>,
      %cst_39 = arith.constant 0.000000e+00 : f32
      %41 = vector.broadcast %cst_39 : f32 to vector<2x1x1xf32>
      %c0_40 = arith.constant 0 : index
      %c0_41 = arith.constant 0 : index
      %c0_42 = arith.constant 0 : index
      %42 = vector.load %arg8[%c0_40, %c0_41, %c0_42] : memref<2x1x1xf32, #tpu.memory_space<vmem>>, vector<2x1x1xf32>
      tpu.vector_store %arg8[%c0_40, %c0_41, %c0_42], %41 {strides = array<i32>} : memref<2x1x1xf32, #tpu.memory_space<vmem>>, vector<2x1x1xf32>,
      %cst_43 = arith.constant 0.000000e+00 : f32
      %43 = vector.broadcast %cst_43 : f32 to vector<2x1x1xf32>
      %c0_44 = arith.constant 0 : index
      %c0_45 = arith.constant 0 : index
      %c0_46 = arith.constant 0 : index
      %44 = vector.load %arg9[%c0_44, %c0_45, %c0_46] : memref<2x1x1xf32, #tpu.memory_space<vmem>>, vector<2x1x1xf32>
      tpu.vector_store %arg9[%c0_44, %c0_45, %c0_46], %43 {strides = array<i32>} : memref<2x1x1xf32, #tpu.memory_space<vmem>>, vector<2x1x1xf32>,
    } else {
    }
    %c0 = arith.constant 0 : index
    %c0_1 = arith.constant 0 : index
    %c0_2 = arith.constant 0 : index
    %3 = vector.load %arg2[%c0, %c0_1, %c0_2] : memref<2x8x32xf32, #tpu.memory_space<vmem>>, vector<2x8x32xf32>
    %4 = arith.mulf %3, %3 : vector<2x8x32xf32>
    %cst = arith.constant 1.000000e+00 : f32
    %5 = vector.broadcast %cst : f32 to vector<2x1x32xf32>
    "tpu.trace_start"() <{level = 10 : i32, message = "boh,bsh->bos"}> : () -> ()
    %cst_3 = arith.constant dense<0.000000e+00> : vector<2x1x8xf32>
    %6 = tpu.matmul %5, %3, %cst_3 {dimension_numbers = #tpu.dot_dimension_numbers<[2], [2], [1], [1], [0, 0, 0, 1, 1, 1], [0], [0]>} : vector<2x1x32xf32>, vector<2x8x32xf32>, vector<2x1x8xf32> -> vector<2x1x8xf32>
    %cst_4 = arith.constant dense<0.000000e+00> : vector<2x1x8xf32>
    %7 = tpu.matmul %5, %4, %cst_4 {dimension_numbers = #tpu.dot_dimension_numbers<[2], [2], [1], [1], [0, 0, 0, 1, 1, 1], [0], [0]>} : vector<2x1x32xf32>, vector<2x8x32xf32>, vector<2x1x8xf32> -> vector<2x1x8xf32>
    "tpu.trace_stop"() : () -> ()
    %cst_5 = arith.constant 3.125000e-02 : f32
    %8 = vector.broadcast %cst_5 : f32 to vector<2x1x8xf32>
    %9 = arith.mulf %6, %8 : vector<2x1x8xf32>
    %cst_6 = arith.constant 3.125000e-02 : f32
    %10 = vector.broadcast %cst_6 : f32 to vector<2x1x8xf32>
    %11 = arith.mulf %7, %10 : vector<2x1x8xf32>
    %12 = arith.mulf %9, %9 : vector<2x1x8xf32>
    %13 = arith.subf %11, %12 : vector<2x1x8xf32>
    %cst_7 = arith.constant 0.000000e+00 : f32
    %14 = vector.broadcast %cst_7 : f32 to vector<2x1x8xf32>
    %15 = arith.maximumf %13, %14 : vector<2x1x8xf32>
    %cst_8 = arith.constant 9.99999974E-6 : f32
    %16 = vector.broadcast %cst_8 : f32 to vector<2x1x8xf32>
    %17 = arith.addf %15, %16 : vector<2x1x8xf32>
    %18 = math.rsqrt %17 : vector<2x1x8xf32>
    %c0_9 = arith.constant 0 : index
    %c0_10 = arith.constant 0 : index
    %c0_11 = arith.constant 0 : index
    %19 = vector.load %arg3[%c0_9, %c0_10, %c0_11] : memref<2x1x8xf32, #tpu.memory_space<vmem>>, vector<2x1x8xf32>
    %20 = arith.mulf %19, %18 : vector<2x1x8xf32>
    %c0_12 = arith.constant 0 : index
    %c0_13 = arith.constant 0 : index
    %c0_14 = arith.constant 0 : index
    %21 = vector.load %arg7[%c0_12, %c0_13, %c0_14] : memref<2x1x32xf32, #tpu.memory_space<vmem>>, vector<2x1x32xf32>
    "tpu.trace_start"() <{level = 10 : i32, message = "bos,bsh->boh"}> : () -> ()
    %cst_15 = arith.constant dense<0.000000e+00> : vector<2x1x32xf32>
    %22 = tpu.matmul %20, %3, %cst_15 {dimension_numbers = #tpu.dot_dimension_numbers<[2], [1], [1], [2], [0, 0, 0, 1, 1, 2], [0], [0]>} : vector<2x1x8xf32>, vector<2x8x32xf32>, vector<2x1x32xf32> -> vector<2x1x32xf32>
    "tpu.trace_stop"() : () -> ()
    %23 = arith.addf %21, %22 : vector<2x1x32xf32>
    %c0_16 = arith.constant 0 : index
    %c0_17 = arith.constant 0 : index
    %c0_18 = arith.constant 0 : index
    %24 = vector.load %arg7[%c0_16, %c0_17, %c0_18] : memref<2x1x32xf32, #tpu.memory_space<vmem>>, vector<2x1x32xf32>
    tpu.vector_store %arg7[%c0_16, %c0_17, %c0_18], %23 {strides = array<i32>} : memref<2x1x32xf32, #tpu.memory_space<vmem>>, vector<2x1x32xf32>,
    %c0_19 = arith.constant 0 : index
    %c0_20 = arith.constant 0 : index
    %c0_21 = arith.constant 0 : index
    %25 = vector.load %arg8[%c0_19, %c0_20, %c0_21] : memref<2x1x1xf32, #tpu.memory_space<vmem>>, vector<2x1x1xf32>
    %26 = arith.mulf %20, %9 : vector<2x1x8xf32>
    %cst_22 = arith.constant dense<0.000000e+00> : vector<2x1xf32>
    %27 = vector.multi_reduction <add>, %26, %cst_22 [2] : vector<2x1x8xf32> to vector<2x1xf32>
    %28 = vector.shape_cast %27 : vector<2x1xf32> to vector<2x1x1xf32>
    %29 = arith.addf %25, %28 : vector<2x1x1xf32>
    %c0_23 = arith.constant 0 : index
    %c0_24 = arith.constant 0 : index
    %c0_25 = arith.constant 0 : index
    %30 = vector.load %arg8[%c0_23, %c0_24, %c0_25] : memref<2x1x1xf32, #tpu.memory_space<vmem>>, vector<2x1x1xf32>
    tpu.vector_store %arg8[%c0_23, %c0_24, %c0_25], %29 {strides = array<i32>} : memref<2x1x1xf32, #tpu.memory_space<vmem>>, vector<2x1x1xf32>,
    %c0_26 = arith.constant 0 : index
    %c0_27 = arith.constant 0 : index
    %c0_28 = arith.constant 0 : index
    %31 = vector.load %arg9[%c0_26, %c0_27, %c0_28] : memref<2x1x1xf32, #tpu.memory_space<vmem>>, vector<2x1x1xf32>
    %cst_29 = arith.constant dense<0.000000e+00> : vector<2x1xf32>
    %32 = vector.multi_reduction <add>, %19, %cst_29 [2] : vector<2x1x8xf32> to vector<2x1xf32>
    %33 = vector.shape_cast %32 : vector<2x1xf32> to vector<2x1x1xf32>
    %34 = arith.addf %31, %33 : vector<2x1x1xf32>
    %c0_30 = arith.constant 0 : index
    %c0_31 = arith.constant 0 : index
    %c0_32 = arith.constant 0 : index
    %35 = vector.load %arg9[%c0_30, %c0_31, %c0_32] : memref<2x1x1xf32, #tpu.memory_space<vmem>>, vector<2x1x1xf32>
    tpu.vector_store %arg9[%c0_30, %c0_31, %c0_32], %34 {strides = array<i32>} : memref<2x1x1xf32, #tpu.memory_space<vmem>>, vector<2x1x1xf32>,
    %c0_i32_33 = arith.constant 0 : i32
    %36 = arith.cmpi eq, %arg1, %c0_i32_33 : i32
    %37 = arith.extui %36 : i1 to i32
    %c0_i32_34 = arith.constant 0 : i32
    %38 = arith.cmpi ne, %37, %c0_i32_34 : i32
    scf.if %38 {
      %c0_35 = arith.constant 0 : index
      %c0_36 = arith.constant 0 : index
      %c0_37 = arith.constant 0 : index
      %39 = vector.load %arg4[%c0_35, %c0_36, %c0_37] : memref<1x1x32xf32, #tpu.memory_space<vmem>>, vector<1x1x32xf32>
      %c0_38 = arith.constant 0 : index
      %c0_39 = arith.constant 0 : index
      %c0_40 = arith.constant 0 : index
      %40 = vector.load %arg5[%c0_38, %c0_39, %c0_40] : memref<1x1x32xf32, #tpu.memory_space<vmem>>, vector<1x1x32xf32>
      %c0_41 = arith.constant 0 : index
      %c0_42 = arith.constant 0 : index
      %c0_43 = arith.constant 0 : index
      %41 = vector.load %arg9[%c0_41, %c0_42, %c0_43] : memref<2x1x1xf32, #tpu.memory_space<vmem>>, vector<2x1x1xf32>
      %c0_44 = arith.constant 0 : index
      %c0_45 = arith.constant 0 : index
      %c0_46 = arith.constant 0 : index
      %42 = vector.load %arg7[%c0_44, %c0_45, %c0_46] : memref<2x1x32xf32, #tpu.memory_space<vmem>>, vector<2x1x32xf32>
      %c0_47 = arith.constant 0 : index
      %c0_48 = arith.constant 0 : index
      %c0_49 = arith.constant 0 : index
      %43 = vector.load %arg8[%c0_47, %c0_48, %c0_49] : memref<2x1x1xf32, #tpu.memory_space<vmem>>, vector<2x1x1xf32>
      %44 = vector.broadcast %43 : vector<2x1x1xf32> to vector<2x1x32xf32>
      %45 = arith.subf %42, %44 : vector<2x1x32xf32>
      %46 = vector.broadcast %39 : vector<1x1x32xf32> to vector<2x1x32xf32>
      %47 = arith.mulf %46, %45 : vector<2x1x32xf32>
      %48 = vector.broadcast %40 : vector<1x1x32xf32> to vector<2x1x32xf32>
      %49 = vector.broadcast %41 : vector<2x1x1xf32> to vector<2x1x32xf32>
      %50 = arith.mulf %48, %49 : vector<2x1x32xf32>
      %51 = arith.addf %47, %50 : vector<2x1x32xf32>
      %cst_50 = arith.constant 9.99999993E-9 : f32
      %52 = vector.broadcast %cst_50 : f32 to vector<2x1x1xf32>
      %53 = arith.addf %41, %52 : vector<2x1x1xf32>
      %54 = vector.broadcast %53 : vector<2x1x1xf32> to vector<2x1x32xf32>
      %55 = arith.divf %51, %54 : vector<2x1x32xf32>
      %c0_51 = arith.constant 0 : index
      %c0_52 = arith.constant 0 : index
      %c0_53 = arith.constant 0 : index
      %56 = vector.load %arg6[%c0_51, %c0_52, %c0_53] : memref<2x1x32xf32, #tpu.memory_space<vmem>>, vector<2x1x32xf32>
      tpu.vector_store %arg6[%c0_51, %c0_52, %c0_53], %55 {strides = array<i32>} : memref<2x1x32xf32, #tpu.memory_space<vmem>>, vector<2x1x32xf32>,
    } else {
    }
    return
  }
  func.func @transform_0(%arg0: i32, %arg1: i32) -> (i32, i32, i32) {
    %c0_i32 = arith.constant 0 : i32
    %c0_i32_0 = arith.constant 0 : i32
    return %arg0, %arg1, %c0_i32 : i32, i32, i32
  }
  func.func @transform_1(%arg0: i32, %arg1: i32) -> (i32, i32, i32) {
    %c0_i32 = arith.constant 0 : i32
    %c0_i32_0 = arith.constant 0 : i32
    return %arg0, %c0_i32, %arg1 : i32, i32, i32
  }
  func.func @transform_2(%arg0: i32, %arg1: i32) -> (i32, i32, i32) {
    %c0_i32 = arith.constant 0 : i32
    %c0_i32_0 = arith.constant 0 : i32
    %c0_i32_1 = arith.constant 0 : i32
    %c0_i32_2 = arith.constant 0 : i32
    return %c0_i32, %c0_i32_0, %c0_i32_1 : i32, i32, i32
  }
  func.func @transform_3(%arg0: i32, %arg1: i32) -> (i32, i32, i32) {
    %c0_i32 = arith.constant 0 : i32
    %c0_i32_0 = arith.constant 0 : i32
    %c0_i32_1 = arith.constant 0 : i32
    %c0_i32_2 = arith.constant 0 : i32
    return %c0_i32, %c0_i32_0, %c0_i32_1 : i32, i32, i32
  }
  func.func @transform_4(%arg0: i32, %arg1: i32) -> (i32, i32, i32) {
    %c0_i32 = arith.constant 0 : i32
    %c0_i32_0 = arith.constant 0 : i32
    %c0_i32_1 = arith.constant 0 : i32
    return %arg0, %c0_i32, %c0_i32_0 : i32, i32, i32
  }
}

</mosaic_0001>

<bundles_post_ra>
// kernel: tpu_custom_call.1
= control target key start
LH: loop header
LB: loop body
LE: loop exit
PB: predicated region body
PF: predicated region fallthrough
CT: control target
= control target key end

     0   :  { %9 = vsyncpa [#allocation6], 0  ;;  %s883_s0 = inlined_call_operand.hbm [shape: f32[2,8,32], index: 0, kind: input, shape index: {}]   ;;  %s884_s1 = inlined_call_operand.vmem [shape: f32[2,1,8], index: 1, kind: input, shape index: {}]   ;;  %s885_s2 = inlined_call_operand.vmem [shape: f32[1,1,32], index: 2, kind: input, shape index: {}]   ;;  %s886_s3 = inlined_call_operand.vmem [shape: f32[1,1,32], index: 3, kind: input, shape index: {}]   ;;  %s887_s4 = inlined_call_operand.hbm [shape: f32[2,1,32], index: 4, kind: output, shape index: {}]  }
   0x1   :  { %10 = vsyncpa [#allocation7], 0  ;;  %s762_s15 = smov [#allocation5]   ;;  %s714_s19 = scalar_lea.hbm %s883_s0, 256 }
   0x2   :  { %s16_s16 = sshll.u32 %s762_s15, 4  ;;  %p715_p0 = scmp.ne.s32.totalorder %s883_s0, %s714_s19  ;;  %s17_s16 = int_to_ptr.vmem [resolvable:$true] %s16_s16 }
   0x3   :  { %p718_p1 = scmp.lt.u32.totalorder %s714_s19, %s883_s0 }
   0x5   :  { %p720_p2 = pnand %p718_p1, %p715_p0 }
   0x7   :  { %723 = shalt.err (!%p720_p2)
}
   0x8   :  { %s724_s24 = scalar_lea.vmem %s17_s16, 256  ;;  %p729_p4 = scmp.lt.s32.totalorder %s17_s16, %s17_s16 }
   0x9   :  { %p725_p3 = scmp.ne.s32.totalorder %s17_s16, %s724_s24  ;;  %p730_p5 = scmp.lt.s32.totalorder %s724_s24, %s724_s24 }
   0xb   :  { %p731_p6 = por %p730_p5, %p729_p4 }
   0xd   :  { %p732_p7 = pnand %p731_p6, %p725_p3 }
   0xf   :  { %735 = shalt.err (!%p732_p7)
}
  0x10   :  { %s763_s25 = smov 128   ;;  %s764_s26 = smov 8  }
  0x11   :  { %22 = dma.hbm_to_vmem [thread:$0]  %s883_s0, 256, %s17_s16, [#allocation6], %s763_s25, %s763_s25, %s764_s26  }
  0x12   :  { %758 = dma.done.wait [#allocation6], 256  }
  0x13   :  { %759 = vsyncadd [#allocation6], 4294967040  ;;  %v765_v0 = vmov 0.0   ;;  %vm766_vm0 = vmmov 0   ;;  %vm48_vm1 = vcmask 261120   ;;  %v44_v1 = vld [vmem:[#allocation5] sm:$0xff] }
  0x14   :  { %664 = vmatprep.subr.mxu0 %v765_v0  ;;  %669 = vmatprep.subr.mxu1 %v765_v0  ;;  %v45_v2 = vld [vmem:[#allocation5 + $0x8] sm:$0xff]  ;;  %v46_v3 = vmul.f32 %v44_v1, %v44_v1  ;;  %v767_v5 = vmov 1.0   ;;  %v358_v6 = vld [vmem:[%s884_s1] sm:$0x1]  ;;  %vm520_vm2 = vcmask 57344   ;;  %vm39_vm3 = vcmask 0  }
  0x15   :  { %666 = vmatprep.mubr.msk.f32.mxu0 %vm766_vm0, %v765_v0  ;;  %671 = vmatprep.mubr.msk.f32.mxu1 %vm766_vm0, %v765_v0  ;;  %v47_v4 = vmul.f32 %v45_v2, %v45_v2  ;;  %v534_v7 = vsel %vm520_vm2, %v358_v6, 0.0  ;;  %v359_v8 = vld [vmem:[%s884_s1 + $0x1] sm:$0x1]  ;;  %42 = vst.msk [vmem:[#allocation4] sm:$0x1] %vm39_vm3, %v765_v0  ;;  %v768_v10 = vmov 0  }
  0x16   :  { %665 = vmatpush3.xpose.msk.msra.mxu0 %vm48_vm1, %v44_v1  ;;  %670 = vmatpush3.xpose.msk.msra.mxu1 %vm48_vm1, %v45_v2  ;;  %v537_v9 = vsel %vm520_vm2, %v359_v8, 0.0  ;;  %40 = vst.msk [vmem:[#allocation3] sm:$0x1] %vm39_vm3, %v765_v0  ;;  %41 = vst.msk [vmem:[#allocation3 + $0x1] sm:$0x1] %vm39_vm3, %v765_v0  ;;  %vm364_vm4 = vcmask 64512  }
  0x17   :  { %674 = vmatprep.subr.mxu0 %v765_v0  ;;  %679 = vmatprep.subr.mxu1 %v765_v0  ;;  %43 = vst.msk [vmem:[#allocation4 + $0x1] sm:$0x1] %vm39_vm3, %v765_v0  ;;  %vm36_vm5 = vcmask 253952  }
  0x18   :  { %535 = vadd.xlane.f32.xlu0 %v534_v7  ;;  %705 = vset.pattern.permute.xlu1 %v768_v10  ;;  %37 = vst.msk [vmem:[#allocation2] sm:$0x1] %vm36_vm5, %v765_v0  ;;  %38 = vst.msk [vmem:[#allocation2 + $0x1] sm:$0x1] %vm36_vm5, %v765_v0 }
  0x19   :  { %667 = vmatmul.mubr.msk.f32.vlgmr.msra.gmra.mrb[0].mxu0 %vm48_vm1, %v767_v5  ;;  %672 = vmatmul.mubr.msk.f32.vlgmr.msra.gmra.mrb[0].mxu1 %vm48_vm1, %v767_v5 }
  0x1a   :  { %675 = vmatpush3.xpose.msk.msra.mxu0 %vm48_vm1, %v46_v3  ;;  %680 = vmatpush3.xpose.msk.msra.mxu1 %vm48_vm1, %v47_v4 }
  0x1b   :  { %676 = vmatprep.mubr.msk.f32.mxu0 %vm766_vm0, %v765_v0  ;;  %681 = vmatprep.mubr.msk.f32.mxu1 %vm766_vm0, %v765_v0 }
  0x1c   :  { %684 = vmatprep.subr.mxu0 %v765_v0  ;;  %689 = vmatprep.subr.mxu1 %v765_v0  ;;  %v532_v31 = vld [vmem:[#allocation4] sm:$0x1] }
  0x1d   :  { %677 = vmatmul.mubr.msk.f32.vlgmr.msra.gmra.mrb[2].mxu0 %vm48_vm1, %v767_v5  ;;  %682 = vmatmul.mubr.msk.f32.vlgmr.msra.gmra.mrb[2].mxu1 %vm48_vm1, %v767_v5  ;;  %v516_v49 = vld [vmem:[#allocation3] sm:$0x1]  ;;  %v517_v52 = vld [vmem:[#allocation3 + $0x1] sm:$0x1] }
  0x1e   :  { %685 = vmatpush3.msra.mxu0 %v44_v1  ;;  %686 = vmatprep.mubr.msk.f32.mxu0 %vm766_vm0, %v765_v0  ;;  %v533_v34 = vld [vmem:[#allocation4 + $0x1] sm:$0x1]  ;;  %v560_v1 = vlaneseq }
  0x1f   :  { %690 = vmatpush3.msra.mxu1 %v45_v2  ;;  %691 = vmatprep.mubr.msk.f32.mxu1 %vm766_vm0, %v765_v0  ;;  %v362_v57 = vld [vmem:[#allocation2] sm:$0x1]  ;;  %v363_v58 = vld [vmem:[#allocation2 + $0x1] sm:$0x1] }
  0x20   :  { %538 = vadd.xlane.f32.xlu0 %v537_v9  ;;  %v561_v2 = vshrl.u32 %v560_v1, 7 }
  0x21   :  { %704 = vset.pattern.permute.xlu0 %v768_v10 }
  0x22   :  { %v562_v5 = vsub.s32 0, %v561_v2 }
  0xa5   :  { %v536_v32 = vpop.xlane.xlu0 %535 }
  0xa6   :  { %v540_v33 = vadd.f32 %v536_v32, %v532_v31 }
  0xa8   :  { %542 = vst.msk [vmem:[#allocation4] sm:$0x1] %vm39_vm3, %v540_v33 }
  0xad   :  { %v539_v36 = vpop.xlane.xlu0 %538 }
  0xae   :  { %v541_v39 = vadd.f32 %v539_v36, %v533_v34 }
  0xaf   :  { %v549_v44 = vld [vmem:[#allocation4] sm:$0x1] }
  0xb0   :  { %543 = vst.msk [vmem:[#allocation4 + $0x1] sm:$0x1] %vm39_vm3, %v541_v39  ;;  %v599_v45 = vadd.f32 1e-08, %v549_v44 }
  0xb2   :  { %603 = vperm.xlu0 %704, %v599_v45  }
  0xb7   :  { %v550_v47 = vld [vmem:[#allocation4 + $0x1] sm:$0x1] }
  0xb8   :  { %v600_v48 = vadd.f32 1e-08, %v550_v47 }
  0xec   :  { %v121_v11 = vpop.f32.mrb[0].mxu0  ;;  %v194_v12 = vpop.f32.mrb[0].mxu1 }
  0xed   :  { %v344_v13 = vmul.f32 0.03125, %v121_v11  ;;  %v668_v14 = vpop.f32.mrb[1].mxu0  ;;  %v345_v15 = vmul.f32 0.03125, %v194_v12  ;;  %v673_v16 = vpop.f32.mrb[1].mxu1  ;;  %v548_v12 = vld [vmem:[%s886_s3] sm:$0x1] }
  0xee   :  { %s769_s3 = smov [#allocation8]  }
  0xef   :  { %v349_v17 = vmul.f32 %v345_v15, %v345_v15  ;;  %v348_v20 = vmul.f32 %v344_v13, %v344_v13 }
  0xf0   :  { %v267_v18 = vpop.f32.mrb[2].mxu0  ;;  %v340_v19 = vpop.f32.mrb[2].mxu1 }
  0xf1   :  { %v346_v21 = vmul.f32 0.03125, %v267_v18  ;;  %v347_v22 = vmul.f32 0.03125, %v340_v19  ;;  %v678_v23 = vpop.f32.mrb[3].mxu0  ;;  %v683_v24 = vpop.f32.mrb[3].mxu1 }
  0xf3   :  { %v350_v25 = vsub.f32 %v346_v21, %v348_v20  ;;  %v351_v26 = vsub.f32 %v347_v22, %v349_v17 }
  0xf5   :  { %v352_v27 = vmax.f32 %v350_v25, 0.0  ;;  %v353_v28 = vmax.f32 %v351_v26, 0.0 }
  0xf7   :  { %v354_v29 = vadd.f32 1e-05, %v352_v27  ;;  %v355_v30 = vadd.f32 1e-05, %v353_v28 }
  0xf9   :  { %706 = vrsqrt.f32 %v354_v29 }
  0xfa   :  { %708 = vrsqrt.f32 %v355_v30 }
 0x103   :  { %v707_v35 = vpop.eup %706 }
 0x104   :  { %v709_v37 = vpop.eup %708  ;;  %v360_v38 = vmul.f32 %v707_v35, %v358_v6 }
 0x105   :  { %v361_v40 = vmul.f32 %v709_v37, %v359_v8 }
 0x106   :  { %687 = vmatmul.mubr.msk.f32.vlgmr.msra.gmra.mrb[4].mxu0 %vm364_vm4, %v360_v38  ;;  %v518_v41 = vmul.f32 %v360_v38, %v344_v13  ;;  %v547_v13 = vld [vmem:[%s885_s2] sm:$0x1]  ;;  %s630_s2 = sshll.u32 %s769_s3, 4  ;;  %s631_s2 = int_to_ptr.vmem [resolvable:$true] %s630_s2 }
 0x107   :  { %692 = vmatmul.mubr.msk.f32.vlgmr.msra.gmra.mrb[4].mxu1 %vm364_vm4, %v361_v40  ;;  %v519_v42 = vmul.f32 %v361_v40, %v345_v15  ;;  %s736_s9 = scalar_lea.vmem %s631_s2, 32  ;;  %p741_p9 = scmp.lt.s32.totalorder %s631_s2, %s631_s2 }
 0x108   :  { %v521_v43 = vsel %vm520_vm2, %v518_v41, 0.0  ;;  %p737_p8 = scmp.ne.s32.totalorder %s631_s2, %s736_s9  ;;  %p742_p10 = scmp.lt.s32.totalorder %s736_s9, %s736_s9 }
 0x109   :  { %522 = vadd.xlane.f32.xlu1 %v521_v43  ;;  %v524_v46 = vsel %vm520_vm2, %v519_v42, 0.0 }
 0x10a   :  { %p743_p11 = por %p742_p10, %p741_p9 }
 0x10c   :  { %p744_p12 = pnand %p743_p11, %p737_p8 }
 0x10d   :  { %525 = vadd.xlane.f32.xlu1 %v524_v46 }
 0x11e   :  { %612 = vperm.xlu1 %705, %v600_v48  }
 0x122   :  { %579 = vperm.xlu1 %705, %v549_v44  }
 0x131   :  { %v604_v4 = vpop.permute.xlu0 %603 }
 0x132   :  { %v609_v6 = vrot.slane %v604_v4, %v562_v5 }
 0x134   :  { %710 = vrcp.f32 %v609_v6 }
 0x13e   :  { %v711_v23 = vpop.eup %710 }
 0x196   :  { %v523_v50 = vpop.xlane.xlu1 %522 }
 0x197   :  { %v527_v51 = vadd.f32 %v523_v50, %v516_v49 }
 0x199   :  { %530 = vst.msk [vmem:[#allocation3] sm:$0x1] %vm39_vm3, %v527_v51 }
 0x19a   :  { %v526_v53 = vpop.xlane.xlu1 %525 }
 0x19b   :  { %v528_v54 = vadd.f32 %v526_v53, %v517_v52 }
 0x19d   :  { %531 = vst.msk [vmem:[#allocation3 + $0x1] sm:$0x1] %vm39_vm3, %v528_v54 }
 0x19e   :  { %v613_v3 = vpop.permute.xlu1 %612 }
 0x19f   :  { %v618_v8 = vrot.slane %v613_v3, %v562_v5 }
 0x1a0   :  { %v553_v55 = vld [vmem:[#allocation3] sm:$0x1] }
 0x1a1   :  { %557 = vperm.xlu1 %705, %v553_v55   ;;  %712 = vrcp.f32 %v618_v8 }
 0x1a2   :  { %v580_v7 = vpop.permute.xlu1 %579 }
 0x1a3   :  { %v585_v10 = vrot.slane %v580_v7, %v562_v5 }
 0x1a4   :  { %v554_v56 = vld [vmem:[#allocation3 + $0x1] sm:$0x1] }
 0x1a5   :  { %566 = vperm.xlu1 %705, %v554_v56   ;;  %v595_v17 = vmul.f32 %v585_v10, %v548_v12 }
 0x1a9   :  { %588 = vperm.xlu1 %705, %v550_v47  }
 0x1ab   :  { %v713_v30 = vpop.eup %712 }
 0x1d9   :  { %v434_v59 = vpop.f32.mrb[4].mxu0 }
 0x1da   :  { %v511_v60 = vadd.f32 %v434_v59, %v362_v57  ;;  %v688_v61 = vpop.f32.mrb[5].mxu0  ;;  %v507_v62 = vpop.f32.mrb[4].mxu1 }
 0x1db   :  { %v512_v63 = vadd.f32 %v507_v62, %v363_v58  ;;  %v693_v0 = vpop.f32.mrb[5].mxu1 }
 0x1dc   :  { %514 = vst.msk [vmem:[#allocation2] sm:$0x1] %vm36_vm5, %v511_v60 }
 0x1dd   :  { %515 = vst.msk [vmem:[#allocation2 + $0x1] sm:$0x1] %vm36_vm5, %v512_v63 }
 0x1e3   :  { %v551_v14 = vld [vmem:[#allocation2] sm:$0x1] }
 0x1e4   :  { %v552_v20 = vld [vmem:[#allocation2 + $0x1] sm:$0x1] }
 0x220   :  { %v558_v9 = vpop.permute.xlu1 %557 }
 0x221   :  { %v563_v11 = vrot.slane %v558_v9, %v562_v5 }
 0x223   :  { %v573_v15 = vsub.f32 %v551_v14, %v563_v11 }
 0x224   :  { %v567_v16 = vpop.permute.xlu1 %566 }
 0x225   :  { %v575_v18 = vmul.f32 %v573_v15, %v547_v13  ;;  %v572_v19 = vrot.slane %v567_v16, %v562_v5 }
 0x227   :  { %v597_v21 = vadd.f32 %v595_v17, %v575_v18  ;;  %v574_v22 = vsub.f32 %v552_v20, %v572_v19 }
 0x228   :  { %v589_v24 = vpop.permute.xlu1 %588 }
 0x229   :  { %v620_v25 = vmul.f32 %v711_v23, %v597_v21  ;;  %v594_v26 = vrot.slane %v589_v24, %v562_v5  ;;  %v576_v27 = vmul.f32 %v574_v22, %v547_v13 }
 0x22b   :  { %623 = vst.msk [vmem:[#allocation8] sm:$0x1] %vm36_vm5, %v620_v25  ;;  %v596_v28 = vmul.f32 %v594_v26, %v548_v12 }
 0x22d   :  { %v598_v29 = vadd.f32 %v596_v28, %v576_v27 }
 0x22f   :  { %v622_v31 = vmul.f32 %v713_v30, %v598_v29 }
 0x231   :  { %624 = vst.msk [vmem:[#allocation8 + $0x1] sm:$0x1] %vm36_vm5, %v622_v31 }
 0x232   :  { %747 = shalt.err (!%p744_p12)
}
 0x233   :  { %s748_s12 = scalar_lea.hbm %s887_s4, 32 }
 0x234   :  { %p749_p13 = scmp.ne.s32.totalorder %s887_s4, %s748_s12  ;;  %p752_p0 = scmp.lt.u32.totalorder %s748_s12, %s887_s4 }
 0x236   :  { %p754_p1 = pnand %p752_p0, %p749_p13 }
 0x238   :  { %757 = shalt.err (!%p754_p1)
}
 0x239   :  { %s770_s17 = smov 16   ;;  %s771_s18 = smov 1  }
 0x23a   :  { %636 = dma.vmem_to_hbm [thread:$0]  %s631_s2, 32, %s887_s4, [#allocation7], %s770_s17, %s770_s17, %s771_s18  }
 0x23b   :  { %760 = dma.done.wait [#allocation7], 32  }
 0x23c   :  { %761 = vsyncadd [#allocation7], 4294967264 }
 0x23d   :  { %640 = vsyncpa [#allocation6], 1 }
 0x23e   :  { %641 = vsyncpa [#allocation7], 1 }

</bundles_post_ra>
